<compile_context>
chip_gen: v5e
topology: v5e:2x2
jax: 0.10.0
libtpu: 0.0.40
codegen_flags: <defaults>
</compile_context>

<pallas_src>
import functools

import jax
import jax.numpy as jnp
from jax.experimental import pallas as pl
from jax.experimental.pallas import tpu as pltpu

HIDDEN = 500          # nn.Linear(latent_dims, 500)
_LANE = 128
_SUBLANE = 8


def _round_up(x, m):
    return (x + m - 1) // m * m


def _cdiv(a, b):
    return -(-a // b)


# ----------------------------------------------------------------------------
# Kernel
# ----------------------------------------------------------------------------
def decoder_kernel(z_ref, w1_ref, b1_ref, w2_ref, b2_ref, o_ref):
    # z_ref : (TB, L)  f32    w1_ref: (L, Hp)  bf16   b1_ref: (1, Hp)  f32
    # w2_ref: (Hp, TN) bf16   b2_ref: (1, TN)  f32    o_ref : (TB, TN) f32
    z = z_ref[...].astype(jnp.bfloat16)

    # linear1 + ReLU : bf16 operands, f32 accumulate, f32 epilogue
    h = jnp.dot(z, w1_ref[...], preferred_element_type=jnp.float32) + b1_ref[...]
    h = jnp.maximum(h, 0.0)

    # TODO(synk): training-mode Dropout(p=0.15) is stochastic and not reproduced
    # (eval-mode dropout == identity). If needed, fuse pltpu.prng_seed +
    # pltpu.prng_random_bits on the h tile with 1/(1-p) scaling, seeded per step.

    # linear2 + sigmoid (logistic lowers to the EUP path)
    y = jnp.dot(h.astype(jnp.bfloat16), w2_ref[...],
                preferred_element_type=jnp.float32) + b2_ref[...]
    o_ref[...] = jax.nn.sigmoid(y).astype(o_ref.dtype)


# ----------------------------------------------------------------------------
# One-time parameter preparation (transpose + pad + bf16 cast; NOT per call)
# ----------------------------------------------------------------------------
def prepare_decoder_params(w1, b1, w2, b2):
    """PyTorch layout -> (in, out) layout, zero-padded to lane-aligned dims.

    w1: (500, latent_dims), b1: (500,), w2: (input_shape, 500), b2: (input_shape,)
    Zero-padding hidden 500 -> 512 and output to a multiple of 128 is identity:
    zero W1 columns + zero bias give zero ReLU outputs, zero W2 rows contribute
    nothing; padded output columns are sliced off only when needed.
    Weights are stored bf16 (native MXU dtype); biases stay f32 (added to the
    f32 accumulator).
    """
    w1 = jnp.asarray(w1, jnp.float32)   # (H, L)
    b1 = jnp.asarray(b1, jnp.float32)   # (H,)
    w2 = jnp.asarray(w2, jnp.float32)   # (O, H)
    b2 = jnp.asarray(b2, jnp.float32)   # (O,)

    H, L = w1.shape
    O = w2.shape[0]
    Hp = _round_up(H, _LANE)
    Op = _round_up(O, _LANE)

    w1_t = jnp.zeros((L, Hp), jnp.float32).at[:, :H].set(w1.T).astype(jnp.bfloat16)
    b1_p = jnp.zeros((1, Hp), jnp.float32).at[:, :H].set(b1[None, :])
    w2_t = jnp.zeros((Hp, Op), jnp.float32).at[:H, :O].set(w2.T).astype(jnp.bfloat16)
    b2_p = jnp.zeros((1, Op), jnp.float32).at[:, :O].set(b2[None, :])

    return {"w1_t": w1_t, "b1": b1_p, "w2_t": w2_t, "b2": b2_p, "out_dim": int(O)}


# ----------------------------------------------------------------------------
# Generation-aware VMEM budget (v5e/v6e: 128 MiB physical; v7x: 64 MiB)
# ----------------------------------------------------------------------------
@functools.lru_cache(maxsize=1)
def _vmem_budget_and_limit():
    try:
        cap = int(pltpu.get_tpu_info().vmem_capacity_bytes)
    except Exception:
        cap = 64 << 20  # assume the smallest generation (v7x) if the query fails
    limit = min(cap * 3 // 4, 100 << 20)   # scoped limit: ~48 MiB v7x, ~96 MiB v5e/v6e
    budget = limit * 3 // 4                # tile-sizing budget with headroom below it
    return budget, limit


# ----------------------------------------------------------------------------
# Probe: is BlockSpec(pipeline_mode=pl.Buffered(1)) supported end-to-end?
# (Single-buffering grid-invariant weights halves their VMEM footprint; fall
#  back to default double-buffering if the installed JAX rejects it.)
# ----------------------------------------------------------------------------
@functools.lru_cache(maxsize=1)
def _single_buffer_supported():
    try:
        def k(x_ref, o_ref):
            o_ref[...] = x_ref[...]
        x = jnp.zeros((_SUBLANE, _LANE), jnp.float32)
        out = pl.pallas_call(
            k,
            out_shape=jax.ShapeDtypeStruct((_SUBLANE, _LANE), jnp.float32),
            grid=(1,),
            in_specs=[pl.BlockSpec((_SUBLANE, _LANE), lambda i: (0, 0),
                                   pipeline_mode=pl.Buffered(1))],
            out_specs=pl.BlockSpec((_SUBLANE, _LANE), lambda i: (0, 0)),
        )(x)
        jax.block_until_ready(out)
        return True
    except Exception:
        return False


# ----------------------------------------------------------------------------
# Tile-size choice
# ----------------------------------------------------------------------------
def _choose_tiles(batch, latent, hidden_p, out_p, budget_bytes):
    # Weight accounting assumes double-buffering even when Buffered(1) is in
    # effect, so the budget never depends on the probe result (extra slack only).
    wbuf = 2
    # Output-dim tile: keep the W2 tile bounded when input_shape is large.
    tn = out_p
    while tn > _LANE and wbuf * (hidden_p * tn * 2 + tn * 4) > budget_bytes // 3:
        tn = _round_up(tn // 2, _LANE)
    resident = wbuf * (latent * hidden_p * 2 + hidden_p * 4
                       + hidden_p * tn * 2 + tn * 4)
    # per-row: double-buffered z/out tiles + f32/bf16 h and y temporaries
    per_row = 4 * (2 * latent + 3 * tn) + 6 * hidden_p
    avail = budget_bytes - resident
    tb = _SUBLANE if avail <= 0 else max(_SUBLANE, (avail // per_row) // _SUBLANE * _SUBLANE)
    tb = min(tb, 2048)                               # amortize ~0.35 us/step overhead
    tb = min(tb, _round_up(batch, _SUBLANE))         # never exceed the batch
    if batch > _SUBLANE:                             # >=2 steps so v7x uses both TCs
        tb = min(tb, _round_up(_cdiv(batch, 2), _SUBLANE))
    return int(max(tb, _SUBLANE)), int(tn)


# ----------------------------------------------------------------------------
# Forward
# ----------------------------------------------------------------------------
@functools.partial(jax.jit, static_argnames=("out_dim", "single_buffer"))
def _decoder_forward_impl(z, w1_t, b1, w2_t, b2, *, out_dim, single_buffer):
    B, L = z.shape
    Hp = w1_t.shape[1]
    Op = w2_t.shape[1]

    budget, vmem_limit = _vmem_budget_and_limit()

    # No wrapper-side HBM padding for normal batches: ragged last block is
    # handled by the grid (output padding dropped).  Only tiny batches (< one
    # sublane) get a negligible row pad.
    Br = B
    if B < _SUBLANE:
        z = jnp.pad(z, ((0, _SUBLANE - B), (0, 0)))
        Br = _SUBLANE

    tb, tn = _choose_tiles(Br, L, Hp, Op, budget)
    gm = _cdiv(Br, tb)
    gn = _cdiv(Op, tn)

    def spec(shape, imap, grid_invariant):
        if grid_invariant and single_buffer:
            return pl.BlockSpec(shape, imap, pipeline_mode=pl.Buffered(1))
        return pl.BlockSpec(shape, imap)

    flops = 2 * Br * (L * Hp + Hp * Op)
    bytes_accessed = (4 * Br * L + 2 * L * Hp + 4 * Hp
                      + gn * (2 * Hp * tn + 4 * tn) + 4 * Br * Op)

    out = pl.pallas_call(
        decoder_kernel,
        out_shape=jax.ShapeDtypeStruct((Br, Op), z.dtype),
        # W2 tile on the outer axis, batch tile inner -> each W2 tile is DMA'd
        # once while z/out tiles stream.
        grid=(gn, gm),
        in_specs=[
            spec((tb, L), lambda j, i: (i, 0), False),       # z streams
            spec((L, Hp), lambda j, i: (0, 0), True),        # W1 resident
            spec((1, Hp), lambda j, i: (0, 0), True),        # b1 resident
            spec((Hp, tn), lambda j, i: (0, j), gn == 1),    # W2 (resident when gn==1)
            spec((1, tn), lambda j, i: (0, j), gn == 1),     # b2
        ],
        out_specs=pl.BlockSpec((tb, tn), lambda j, i: (i, j)),
        compiler_params=pltpu.CompilerParams(
            dimension_semantics=("parallel", "parallel"),    # megacore on v7x
            vmem_limit_bytes=vmem_limit,
        ),
        cost_estimate=pl.CostEstimate(
            flops=flops,
            transcendentals=2 * Br * Op,                     # sigmoid = exp + recip
            bytes_accessed=bytes_accessed,
        ),
    )(z, w1_t, b1, w2_t, b2)

    if Br != B:
        out = out[:B]
    if Op != out_dim:
        out = out[:, :out_dim]
    return out


def decoder_forward(z, params):
    """z: (B, latent_dims), params from prepare_decoder_params. Returns (B, input_shape)."""
    return _decoder_forward_impl(
        z, params["w1_t"], params["b1"], params["w2_t"], params["b2"],
        out_dim=params["out_dim"],
        single_buffer=_single_buffer_supported(),
    )


# ----------------------------------------------------------------------------
# Test
# ----------------------------------------------------------------------------
def _torch_like_linear_init(key, out_features, in_features, dtype=jnp.float32):
    """Deterministic init mimicking nn.Linear default: U(-1/sqrt(fan_in), +1/sqrt(fan_in))."""
    kw, kb = jax.random.split(key)
    bound = 1.0 / jnp.sqrt(jnp.asarray(in_features, dtype))
    w = jax.random.uniform(kw, (out_features, in_features), dtype, -bound, bound)
    b = jax.random.uniform(kb, (out_features,), dtype, -bound, bound)
    return w, b


if __name__ == "__main__":
    latent_dims = 8
    input_shape = 256   # flattened output dimension of the decoder
    batch = 16          # >= 2 batch tiles -> exercises the multi-step / megacore path

    key = jax.random.PRNGKey(0)
    k_z, k_l1, k_l2 = jax.random.split(key, 3)

    z = jax.random.normal(k_z, (batch, latent_dims), jnp.float32)
    w1, b1 = _torch_like_linear_init(k_l1, HIDDEN, latent_dims)   # linear1
    w2, b2 = _torch_like_linear_init(k_l2, input_shape, HIDDEN)   # linear2

    params = prepare_decoder_params(w1, b1, w2, b2)   # transpose/pad/bf16 once
    out = decoder_forward(z, params)
    out = jax.block_until_ready(out)

    # Pure-JAX f32 reference (eval-mode dropout == identity).  Tolerance relaxed
    # because matmul operands are bf16 (accumulation stays f32).
    h_ref = jnp.maximum(z @ w1.T + b1, 0.0)
    ref = jax.nn.sigmoid(h_ref @ w2.T + b2)

    assert out.shape == (batch, input_shape)
    assert jnp.allclose(out, ref, atol=2e-2, rtol=2e-2)
    print("KERNEL_OK")
</pallas_src>

<mosaic_0001>
module attributes {stable_mosaic.version = 11 : i64} {
  func.func @k(%arg0: i32, %arg1: memref<8x128xf32, #tpu.memory_space<vmem>>, %arg2: memref<8x128xf32, #tpu.memory_space<vmem>>) attributes {dimension_semantics = [#tpu.dimension_semantics<arbitrary>], iteration_bounds = array<i64: 1>, scalar_prefetch = 0 : i64, scratch_operands = 0 : i64, tpu.core_type = #tpu.core_type<tc>, window_params = [{pipeline_mode = #tpu.pipeline_mode<synchronous>, transform_indices = @transform_0, window_bounds = array<i64: 8, 128>}, {pipeline_mode = #tpu.pipeline_mode<synchronous>, transform_indices = @transform_1, window_bounds = array<i64: 8, 128>}]} {
    %c0 = arith.constant 0 : index
    %c0_0 = arith.constant 0 : index
    %0 = vector.load %arg1[%c0, %c0_0] : memref<8x128xf32, #tpu.memory_space<vmem>>, vector<8x128xf32>
    %c0_1 = arith.constant 0 : index
    %c0_2 = arith.constant 0 : index
    %1 = vector.load %arg2[%c0_1, %c0_2] : memref<8x128xf32, #tpu.memory_space<vmem>>, vector<8x128xf32>
    tpu.vector_store %arg2[%c0_1, %c0_2], %0 {strides = array<i32>} : memref<8x128xf32, #tpu.memory_space<vmem>>, vector<8x128xf32>,
    return
  }
  func.func @transform_0(%arg0: i32) -> (i32, i32) {
    %c0_i32 = arith.constant 0 : i32
    %c0_i32_0 = arith.constant 0 : i32
    %c0_i32_1 = arith.constant 0 : i32
    return %c0_i32, %c0_i32_0 : i32, i32
  }
  func.func @transform_1(%arg0: i32) -> (i32, i32) {
    %c0_i32 = arith.constant 0 : i32
    %c0_i32_0 = arith.constant 0 : i32
    %c0_i32_1 = arith.constant 0 : i32
    return %c0_i32, %c0_i32_0 : i32, i32
  }
}

module attributes {stable_mosaic.version = 11 : i64} {
  func.func @decoder_kernel(%arg0: i32, %arg1: i32, %arg2: memref<8x8xf32, #tpu.memory_space<vmem>>, %arg3: memref<8x512xbf16, #tpu.memory_space<vmem>>, %arg4: memref<1x512xf32, #tpu.memory_space<vmem>>, %arg5: memref<512x256xbf16, #tpu.memory_space<vmem>>, %arg6: memref<1x256xf32, #tpu.memory_space<vmem>>, %arg7: memref<8x256xf32, #tpu.memory_space<vmem>>) attributes {dimension_semantics = [#tpu.dimension_semantics<parallel>, #tpu.dimension_semantics<parallel>], iteration_bounds = array<i64: 1, 2>, scalar_prefetch = 0 : i64, scratch_operands = 0 : i64, tpu.core_type = #tpu.core_type<tc>, window_params = [{transform_indices = @transform_0, window_bounds = array<i64: 8, 8>}, {pipeline_mode = #tpu.pipeline_mode<synchronous>, transform_indices = @transform_1, window_bounds = array<i64: 8, 512>}, {pipeline_mode = #tpu.pipeline_mode<synchronous>, transform_indices = @transform_2, window_bounds = array<i64: 1, 512>}, {transform_indices = @transform_3, window_bounds = array<i64: 512, 256>}, {transform_indices = @transform_4, window_bounds = array<i64: 1, 256>}, {transform_indices = @transform_5, window_bounds = array<i64: 8, 256>}]} {
    %c0 = arith.constant 0 : index
    %c0_0 = arith.constant 0 : index
    %0 = vector.load %arg2[%c0, %c0_0] : memref<8x8xf32, #tpu.memory_space<vmem>>, vector<8x8xf32>
    %1 = arith.truncf %0 : vector<8x8xf32> to vector<8x8xbf16>
    %c0_1 = arith.constant 0 : index
    %c0_2 = arith.constant 0 : index
    %2 = vector.load %arg3[%c0_1, %c0_2] : memref<8x512xbf16, #tpu.memory_space<vmem>>, vector<8x512xbf16>
    %cst = arith.constant dense<0.000000e+00> : vector<8x512xf32>
    %3 = tpu.matmul %1, %2, %cst {dimension_numbers = #tpu.dot_dimension_numbers<[1], [0], [0], [1], [0, 0, 1, 1], [], []>} : vector<8x8xbf16>, vector<8x512xbf16>, vector<8x512xf32> -> vector<8x512xf32>
    %c0_3 = arith.constant 0 : index
    %c0_4 = arith.constant 0 : index
    %4 = vector.load %arg4[%c0_3, %c0_4] : memref<1x512xf32, #tpu.memory_space<vmem>>, vector<1x512xf32>
    %5 = vector.broadcast %4 : vector<1x512xf32> to vector<8x512xf32>
    %6 = arith.addf %3, %5 : vector<8x512xf32>
    %cst_5 = arith.constant 0.000000e+00 : f32
    %7 = vector.broadcast %cst_5 : f32 to vector<8x512xf32>
    %8 = arith.maximumf %6, %7 : vector<8x512xf32>
    %9 = arith.truncf %8 : vector<8x512xf32> to vector<8x512xbf16>
    %c0_6 = arith.constant 0 : index
    %c0_7 = arith.constant 0 : index
    %10 = vector.load %arg5[%c0_6, %c0_7] : memref<512x256xbf16, #tpu.memory_space<vmem>>, vector<512x256xbf16>
    %cst_8 = arith.constant dense<0.000000e+00> : vector<8x256xf32>
    %11 = tpu.matmul %9, %10, %cst_8 {dimension_numbers = #tpu.dot_dimension_numbers<[1], [0], [0], [1], [0, 0, 1, 1], [], []>} : vector<8x512xbf16>, vector<512x256xbf16>, vector<8x256xf32> -> vector<8x256xf32>
    %c0_9 = arith.constant 0 : index
    %c0_10 = arith.constant 0 : index
    %12 = vector.load %arg6[%c0_9, %c0_10] : memref<1x256xf32, #tpu.memory_space<vmem>>, vector<1x256xf32>
    %13 = vector.broadcast %12 : vector<1x256xf32> to vector<8x256xf32>
    %14 = arith.addf %11, %13 : vector<8x256xf32>
    %15 = arith.negf %14 : vector<8x256xf32>
    %16 = math.exp %15 : vector<8x256xf32>
    %cst_11 = arith.constant 1.000000e+00 : f32
    %17 = vector.broadcast %cst_11 : f32 to vector<8x256xf32>
    %18 = arith.addf %17, %16 : vector<8x256xf32>
    %19 = arith.divf %17, %18 : vector<8x256xf32>
    %c0_12 = arith.constant 0 : index
    %c0_13 = arith.constant 0 : index
    %20 = vector.load %arg7[%c0_12, %c0_13] : memref<8x256xf32, #tpu.memory_space<vmem>>, vector<8x256xf32>
    tpu.vector_store %arg7[%c0_12, %c0_13], %19 {strides = array<i32>} : memref<8x256xf32, #tpu.memory_space<vmem>>, vector<8x256xf32>,
    return
  }
  func.func @transform_0(%arg0: i32, %arg1: i32) -> (i32, i32) {
    %c0_i32 = arith.constant 0 : i32
    %c0_i32_0 = arith.constant 0 : i32
    return %arg1, %c0_i32 : i32, i32
  }
  func.func @transform_1(%arg0: i32, %arg1: i32) -> (i32, i32) {
    %c0_i32 = arith.constant 0 : i32
    %c0_i32_0 = arith.constant 0 : i32
    %c0_i32_1 = arith.constant 0 : i32
    return %c0_i32, %c0_i32_0 : i32, i32
  }
  func.func @transform_2(%arg0: i32, %arg1: i32) -> (i32, i32) {
    %c0_i32 = arith.constant 0 : i32
    %c0_i32_0 = arith.constant 0 : i32
    %c0_i32_1 = arith.constant 0 : i32
    return %c0_i32, %c0_i32_0 : i32, i32
  }
  func.func @transform_3(%arg0: i32, %arg1: i32) -> (i32, i32) {
    %c0_i32 = arith.constant 0 : i32
    %c0_i32_0 = arith.constant 0 : i32
    return %c0_i32, %arg0 : i32, i32
  }
  func.func @transform_4(%arg0: i32, %arg1: i32) -> (i32, i32) {
    %c0_i32 = arith.constant 0 : i32
    %c0_i32_0 = arith.constant 0 : i32
    return %c0_i32, %arg0 : i32, i32
  }
  func.func @transform_5(%arg0: i32, %arg1: i32) -> (i32, i32) {
    %c0_i32 = arith.constant 0 : i32
    return %arg1, %arg0 : i32, i32
  }
}

</mosaic_0001>

<bundles_post_ra>
// kernel: tpu_custom_call.1
= control target key start
LH: loop header
LB: loop body
LE: loop exit
PB: predicated region body
PF: predicated region fallthrough
CT: control target
= control target key end

     0   :  { %6 = vsyncpa [#allocation3], 0  ;;  %s114_s0 = inlined_call_operand.hbm [shape: f32[8,128], index: 0, kind: input, shape index: {}]   ;;  %s115_s1 = inlined_call_operand.hbm [shape: f32[8,128], index: 1, kind: output, shape index: {}]  }
   0x1   :  { %7 = vsyncpa [#allocation4], 0  ;;  %s13_s8 = sshll.u32 %s114_s0, 4  ;;  %s96_s9 = smov [#allocation2]   ;;  %s14_s8 = int_to_ptr.hbm [resolvable:$true] %s13_s8 }
   0x2   :  { %s15_s10 = sshll.u32 %s96_s9, 4  ;;  %s16_s10 = int_to_ptr.vmem [resolvable:$true] %s15_s10 }
   0x3   :  { %18 = dma.hbm_to_vmem [thread:$0]  %s14_s8, 128, %s16_s10, [#allocation3]  }
   0x4   :  { %92 = dma.done.wait [#allocation3], 128  }
   0x5   :  { %93 = vsyncadd [#allocation3], 4294967168  ;;  %s97_s11 = smov [#allocation5]   ;;  %s32_s15 = sshll.u32 %s115_s1, 4  ;;  %v23_v0 = vld [vmem:[#allocation2] sm:$0xff]  ;;  %s33_s15 = int_to_ptr.hbm [resolvable:$true] %s32_s15 }
   0x6   :  { %s30_s12 = sshll.u32 %s97_s11, 4  ;;  %24 = vst [vmem:[#allocation5] sm:$0xff] %v23_v0  ;;  %s31_s12 = int_to_ptr.vmem [resolvable:$true] %s30_s12 }
   0x7   :  { %35 = dma.vmem_to_hbm [thread:$0]  %s31_s12, 128, %s33_s15, [#allocation4]  }
   0x8   :  { %94 = dma.done.wait [#allocation4], 128  }
   0x9   :  { %95 = vsyncadd [#allocation4], 4294967168 }
   0xa   :  { %40 = vsyncpa [#allocation3], 1 }
   0xb   :  { %41 = vsyncpa [#allocation4], 1 }

// kernel: _decoder_forward_impl.1
= control target key start
LH: loop header
LB: loop body
LE: loop exit
PB: predicated region body
PF: predicated region fallthrough
CT: control target
= control target key end

     0   :  { %10 = vsyncpa [#allocation3], 0  ;;  %s1720_s0 = inlined_call_operand.vmem [shape: f32[16,8], index: 0, kind: input, shape index: {}]   ;;  %s1721_s1 = inlined_call_operand.vmem [shape: bf16[8,512], index: 1, kind: input, shape index: {}]   ;;  %s1722_s2 = inlined_call_operand.vmem [shape: f32[1,512], index: 2, kind: input, shape index: {}]   ;;  %s1723_s3 = inlined_call_operand.hbm [shape: bf16[512,256], index: 3, kind: input, shape index: {}]   ;;  %s1724_s4 = inlined_call_operand.vmem [shape: f32[1,256], index: 4, kind: input, shape index: {}]   ;;  %s1725_s5 = inlined_call_operand.hbm [shape: f32[16,256], index: 5, kind: output, shape index: {}]  }
   0x1   :  { %11 = vsyncpa [#allocation4], 0 }
   0x2   :  { %13 = vsyncpa [#allocation4 + $0x1], 0  ;;  %s1596_s18 = smov 0   ;;  %s1598_s19 = smov 0  }
   0x3   :  { %s1600_s20 = smov 0   ;;  %s1602_s21 = smov 0  }
   0x4   :  { %s1604_s22 = smov 0   ;;  %s1606_s23 = smov 0  }
   0x5 LB: > { %s1031_s24 = sadd.s32 4294967295, %s1561_s23   ;;  %s1032_s25 = sadd.s32 4294967294, %s1561_s23   ;;  %s1561_s23 = sphi %s1606_s23, %s19_s23   ;;  %s1557_s22 = sphi %s1604_s22, %s1732_s22   ;;  %s1553_s21 = sphi %s1602_s21, %s1731_s21   ;;  %s1549_s20 = sphi %s1600_s20, %s1730_s20   ;;  %s1545_s19 = sphi %s1598_s19, %s1729_s19   ;;  %s1541_s18 = sphi %s1596_s18, %s1728_s18  }
   0x6   : > { %s28_s26 = sadd.s32 1, %s1557_s22  ;;  %s160_s27 = sadd.s32 1, %s1549_s20 }
   0x7   : > { %p29_p0 = scmp.ge.s32.totalorder %s28_s26, 2  ;;  %p170_p1 = scmp.ne.s32.totalorder %s1549_s20, %s1545_s19 }
   0x8   : > { %p171_p2 = scmp.eq.s32.totalorder %s1031_s24, 1  ;;  %p176_p3 = scmp.ne.s32.totalorder %s1545_s19, %s1541_s18 }
   0x9   : > { %s1734_s26 = smov (%p29_p0, %s28_s26), 0  ;;  %p177_p5 = scmp.eq.s32.totalorder %s1032_s25, 1 }
   0xa   : > { %p1636_p4 = por %p171_p2, %p170_p1  ;;  %s155_s29 = ssub.s32 %s1557_s22, %s1734_s26 }
   0xb   : > { %p1033_p6 = scmp.ge.s32.totalorder %s1561_s23, 1  ;;  %p158_p7 = scmp.eq.s32.totalorder %s155_s29, 0 }
   0xc   : > { %p1643_p8 = por %p177_p5, %p176_p3  ;;  %p184_p9 = scmp.lt.s32.totalorder %s1561_s23, 3 }
   0xd   : > { %s1649_s6 = scalar_select %p158_p7, %s1549_s20, %s160_s27  }
   0xe   : > { %p185_p10 = pnand %p1033_p6, %p184_p9  ;;  %p1387_p11 = scmp.eq.s32.totalorder %s1031_s24, 0 }
   0xf   : > { %s204_s9 = sshll.u32 %s1723_s3, 4  ;;  %s1563_s10 = smov [#allocation2]   ;;  %s205_s9 = int_to_ptr.hbm [resolvable:$true] %s204_s9 }
  0x10   : > { %p1379_p12 = pneg %p185_p10  ;;  %s206_s11 = sshll.u32 %s1563_s10, 4  ;;  %s207_s11 = int_to_ptr.vmem [resolvable:$true] %s206_s11 }
  0x11   : > { %s1564_s12 = smov 128   ;;  %s1565_s13 = smov 8  }
  0x12   : > { %p1380_p13 = pnand %p1387_p11, %p1379_p12  ;;  %237 = sbr.rel (%p185_p10) target bundleno = 356 (0x164), region = 40 }
  0x14   : > { %1382 = dma.hbm_to_vmem [thread:$0]  (!%p1380_p13), %s205_s9, 8192, %s207_s11, [#allocation3], %s1564_s12, %s1564_s12, %s1565_s13  }
  0x17   : > { %1532 = dma.done.wait (%p1387_p11), [#allocation3], 8192  }
  0x18   : > { %1534 = vsyncadd (%p1387_p11), [#allocation3], 4294959104  ;;  %p269_p0 = scmp.lt.s32.totalorder %s1553_s21, 1  ;;  %v283_v0 = vld [vmem:[%s1721_s1] sm:$0xff]  ;;  %v284_v1 = vld [vmem:[%s1721_s1 + $0x8] sm:$0xff]  ;;  %vm309_vm0 = vcmask 1043456  }
  0x19   : > { %v297_v3 = vunpack.c.l.b16 %v283_v0  ;;  %v298_v4 = vunpack.c.h.b16 %v283_v0  ;;  %v299_v5 = vunpack.c.l.b16 %v284_v1  ;;  %v300_v6 = vunpack.c.h.b16 %v284_v1  ;;  %v1103_v7 = vld [vmem:[#allocation2 + $0x70] sm:$0xf]  ;;  %v1323_v8 = vld [vmem:[#allocation2 + $0x74] sm:$0xf0]  ;;  %v1095_v15 = vld [vmem:[#allocation2 + $0x60] sm:$0xf] }
  0x1a   : > { %s270_s14 = scalar_select %p269_p0, %s1553_s21, 1  ;;  %v1167_v9 = vld [vmem:[#allocation2 + $0xf0] sm:$0xf]  ;;  %v1339_v10 = vld [vmem:[#allocation2 + $0xf4] sm:$0xf0]  ;;  %v1104_v20 = vor.u32 %v1323_v8, %v1103_v7  ;;  %vm305_vm1 = vcmask 64512  }
  0x1b   : > { %v301_v11 = vpack.c.b16 %v297_v3, %v297_v3  ;;  %v302_v12 = vpack.c.b16 %v298_v4, %v298_v4  ;;  %v303_v13 = vpack.c.b16 %v299_v5, %v299_v5  ;;  %v304_v14 = vpack.c.b16 %v300_v6, %v300_v6  ;;  %v1321_v16 = vld [vmem:[#allocation2 + $0x64] sm:$0xf0]  ;;  %v1159_v17 = vld [vmem:[#allocation2 + $0xe0] sm:$0xf]  ;;  %v1231_v18 = vld [vmem:[#allocation2 + $0x170] sm:$0xf] }
  0x1c   : > { %s1040_s15 = sshll.u32 %s270_s14, 3  ;;  %v1168_v21 = vor.u32 %v1339_v10, %v1167_v9  ;;  %v1355_v22 = vld [vmem:[#allocation2 + $0x174] sm:$0xf0]  ;;  %v1295_v23 = vld [vmem:[#allocation2 + $0x1f0] sm:$0xf]  ;;  %v1096_v34 = vor.u32 %v1321_v16, %v1095_v15  ;;  %s266_s12 = sand.u32 1, %s1545_s19  }
  0x1d   : > { %s272_s24 = scalar_lea.vmem %s1720_s0, %s1040_s15  ;;  %v1371_v24 = vld [vmem:[#allocation2 + $0x1f4] sm:$0xf0]  ;;  %v311_v25 = vsel %vm309_vm0, %v301_v11, 0  ;;  %v314_v26 = vsel %vm309_vm0, %v302_v12, 0  ;;  %v317_v27 = vsel %vm309_vm0, %v303_v13, 0  ;;  %v320_v28 = vsel %vm309_vm0, %v304_v14, 0 }
  0x1e   : > { %v281_v2 = vld [vmem:[%s272_s24] sm:$0xff]  ;;  %v1337_v29 = vld [vmem:[#allocation2 + $0xe4] sm:$0xf0]  ;;  %329 = vmatpush.bf16.msra.mxu0 %v311_v25  ;;  %342 = vmatpush.bf16.msra.mxu1 %v314_v26  ;;  %v1232_v30 = vor.u32 %v1355_v22, %v1231_v18  ;;  %v1296_v31 = vor.u32 %v1371_v24, %v1295_v23  ;;  %v1087_v32 = vld [vmem:[#allocation2 + $0x50] sm:$0xf]  ;;  %s1039_s13 = sshll.u32 %s266_s12, 4 }
  0x1f   : > { %v282_v19 = vpack.c.bf16 %v281_v2, %v281_v2  ;;  %355 = vmatpush.bf16.msra.mxu2 %v317_v27  ;;  %368 = vmatpush.bf16.msra.mxu3 %v320_v28  ;;  %v1223_v33 = vld [vmem:[#allocation2 + $0x160] sm:$0xf]  ;;  %v1160_v35 = vor.u32 %v1337_v29, %v1159_v17  ;;  %v1353_v36 = vld [vmem:[#allocation2 + $0x164] sm:$0xf0]  ;;  %v1319_v39 = vld [vmem:[#allocation2 + $0x54] sm:$0xf0] }
  0x20   : > { %v1287_v37 = vld [vmem:[#allocation2 + $0x1e0] sm:$0xf]  ;;  %v1369_v38 = vld [vmem:[#allocation2 + $0x1e4] sm:$0xf0]  ;;  %v1151_v40 = vld [vmem:[#allocation2 + $0xd0] sm:$0xf]  ;;  %v1224_v42 = vor.u32 %v1353_v36, %v1223_v33  ;;  %v1088_v46 = vor.u32 %v1319_v39, %v1087_v32 }
  0x21   : > { %1041 = vmatmul.msk.bf16.vlgmr.msra.gmra.mxu0 %vm305_vm1, %v282_v19  ;;  %1042 = vmatmul.msk.bf16.vlgmr.msra.gmra.mxu1 %vm305_vm1, %v282_v19  ;;  %v1335_v41 = vld [vmem:[#allocation2 + $0xd4] sm:$0xf0]  ;;  %v1288_v43 = vor.u32 %v1369_v38, %v1287_v37  ;;  %v1079_v44 = vld [vmem:[#allocation2 + $0x40] sm:$0xf]  ;;  %v1215_v45 = vld [vmem:[#allocation2 + $0x150] sm:$0xf] }
  0x22   : > { %772 = vmatpush.bf16.msrb.mxu0 %v1104_v20  ;;  %785 = vmatpush.bf16.msrb.mxu1 %v1168_v21  ;;  %v1152_v47 = vor.u32 %v1335_v41, %v1151_v40  ;;  %v1351_v48 = vld [vmem:[#allocation2 + $0x154] sm:$0xf0]  ;;  %v1279_v49 = vld [vmem:[#allocation2 + $0x1d0] sm:$0xf]  ;;  %v1317_v51 = vld [vmem:[#allocation2 + $0x44] sm:$0xf0] }
  0x23   : > { %1043 = vmatmul.msk.bf16.vlgmr.msra.gmra.mxu2 %vm305_vm1, %v282_v19  ;;  %1044 = vmatmul.msk.bf16.vlgmr.msra.gmra.mxu3 %vm305_vm1, %v282_v19  ;;  %v1367_v50 = vld [vmem:[#allocation2 + $0x1d4] sm:$0xf0]  ;;  %v1143_v52 = vld [vmem:[#allocation2 + $0xc0] sm:$0xf]  ;;  %v1333_v53 = vld [vmem:[#allocation2 + $0xc4] sm:$0xf0]  ;;  %v1216_v54 = vor.u32 %v1351_v48, %v1215_v45  ;;  %v1080_v58 = vor.u32 %v1317_v51, %v1079_v44 }
  0x24   : > { %798 = vmatpush.bf16.msrb.mxu2 %v1232_v30  ;;  %811 = vmatpush.bf16.msrb.mxu3 %v1296_v31  ;;  %v1280_v55 = vor.u32 %v1367_v50, %v1279_v49  ;;  %v1071_v56 = vld [vmem:[#allocation2 + $0x30] sm:$0xf]  ;;  %v1207_v57 = vld [vmem:[#allocation2 + $0x140] sm:$0xf]  ;;  %v1144_v59 = vor.u32 %v1333_v53, %v1143_v52  ;;  %v1349_v60 = vld [vmem:[#allocation2 + $0x144] sm:$0xf0] }
  0x25   : > { %v1271_v61 = vld [vmem:[#allocation2 + $0x1c0] sm:$0xf]  ;;  %v1365_v62 = vld [vmem:[#allocation2 + $0x1c4] sm:$0xf0]  ;;  %v1315_v63 = vld [vmem:[#allocation2 + $0x34] sm:$0xf0]  ;;  %v1208_v2 = vor.u32 %v1349_v60, %v1207_v57 }
  0x26   : > { %773 = vmatpush.bf16.msrb.mxu0 %v1096_v34  ;;  %786 = vmatpush.bf16.msrb.mxu1 %v1160_v35  ;;  %v1135_v0 = vld [vmem:[#allocation2 + $0xb0] sm:$0xf]  ;;  %v1331_v1 = vld [vmem:[#allocation2 + $0xb4] sm:$0xf0]  ;;  %v1272_v3 = vor.u32 %v1365_v62, %v1271_v61  ;;  %v1063_v4 = vld [vmem:[#allocation2 + $0x20] sm:$0xf]  ;;  %v1072_v6 = vor.u32 %v1315_v63, %v1071_v56 }
  0x27   : > { %v1199_v5 = vld [vmem:[#allocation2 + $0x130] sm:$0xf]  ;;  %v1136_v7 = vor.u32 %v1331_v1, %v1135_v0  ;;  %v1347_v8 = vld [vmem:[#allocation2 + $0x134] sm:$0xf0]  ;;  %v1313_v11 = vld [vmem:[#allocation2 + $0x24] sm:$0xf0] }
  0x28   : > { %799 = vmatpush.bf16.msrb.mxu2 %v1224_v42  ;;  %812 = vmatpush.bf16.msrb.mxu3 %v1288_v43  ;;  %v1263_v9 = vld [vmem:[#allocation2 + $0x1b0] sm:$0xf]  ;;  %v1363_v10 = vld [vmem:[#allocation2 + $0x1b4] sm:$0xf0]  ;;  %v1127_v12 = vld [vmem:[#allocation2 + $0xa0] sm:$0xf]  ;;  %v1200_v14 = vor.u32 %v1347_v8, %v1199_v5  ;;  %v1064_v18 = vor.u32 %v1313_v11, %v1063_v4 }
  0x29   : > { %v1329_v13 = vld [vmem:[#allocation2 + $0xa4] sm:$0xf0]  ;;  %v1264_v15 = vor.u32 %v1363_v10, %v1263_v9  ;;  %v1055_v16 = vld [vmem:[#allocation2 + $0x10] sm:$0xf]  ;;  %v1191_v17 = vld [vmem:[#allocation2 + $0x120] sm:$0xf] }
  0x2a   : > { %774 = vmatpush.bf16.msrb.mxu0 %v1088_v46  ;;  %787 = vmatpush.bf16.msrb.mxu1 %v1152_v47  ;;  %v1128_v19 = vor.u32 %v1329_v13, %v1127_v12  ;;  %v1345_v20 = vld [vmem:[#allocation2 + $0x124] sm:$0xf0]  ;;  %v1255_v21 = vld [vmem:[#allocation2 + $0x1a0] sm:$0xf]  ;;  %v1311_v23 = vld [vmem:[#allocation2 + $0x14] sm:$0xf0] }
  0x2b   : > { %v1361_v22 = vld [vmem:[#allocation2 + $0x1a4] sm:$0xf0]  ;;  %v1119_v24 = vld [vmem:[#allocation2 + $0x90] sm:$0xf]  ;;  %v1327_v25 = vld [vmem:[#allocation2 + $0x94] sm:$0xf0]  ;;  %v1192_v26 = vor.u32 %v1345_v20, %v1191_v17  ;;  %v1056_v31 = vor.u32 %v1311_v23, %v1055_v16 }
  0x2c   : > { %800 = vmatpush.bf16.msrb.mxu2 %v1216_v54  ;;  %813 = vmatpush.bf16.msrb.mxu3 %v1280_v55  ;;  %v1256_v27 = vor.u32 %v1361_v22, %v1255_v21  ;;  %v1047_v28 = vld [vmem:[#allocation2] sm:$0xf]  ;;  %v1309_v29 = vld [vmem:[#allocation2 + $0x4] sm:$0xf0]  ;;  %v1183_v30 = vld [vmem:[#allocation2 + $0x110] sm:$0xf]  ;;  %v1120_v32 = vor.u32 %v1327_v25, %v1119_v24 }
  0x2d   : > { %v1343_v33 = vld [vmem:[#allocation2 + $0x114] sm:$0xf0]  ;;  %v1247_v34 = vld [vmem:[#allocation2 + $0x190] sm:$0xf]  ;;  %v1111_v36 = vld [vmem:[#allocation2 + $0x80] sm:$0xf]  ;;  %v1048_v46 = vor.u32 %v1309_v29, %v1047_v28 }
  0x2e   : > { %775 = vmatpush.bf16.msrb.mxu0 %v1080_v58  ;;  %788 = vmatpush.bf16.msrb.mxu1 %v1144_v59  ;;  %v1359_v35 = vld [vmem:[#allocation2 + $0x194] sm:$0xf0]  ;;  %v1325_v37 = vld [vmem:[#allocation2 + $0x84] sm:$0xf0]  ;;  %v1322_v38 = vld [vmem:[#allocation2 + $0x74] sm:$0xf]  ;;  %v1184_v42 = vor.u32 %v1343_v33, %v1183_v30 }
  0x2f   : > { %v1105_v39 = vld [vmem:[#allocation2 + $0x78] sm:$0xf0]  ;;  %v1338_v40 = vld [vmem:[#allocation2 + $0xf4] sm:$0xf]  ;;  %v1248_v43 = vor.u32 %v1359_v35, %v1247_v34  ;;  %v1175_v44 = vld [vmem:[#allocation2 + $0x100] sm:$0xf]  ;;  %v1112_v47 = vor.u32 %v1325_v37, %v1111_v36 }
  0x30   : > { %801 = vmatpush.bf16.msrb.mxu2 %v1208_v2  ;;  %814 = vmatpush.bf16.msrb.mxu3 %v1272_v3  ;;  %v1169_v41 = vld [vmem:[#allocation2 + $0xf8] sm:$0xf0]  ;;  %v1341_v45 = vld [vmem:[#allocation2 + $0x104] sm:$0xf0]  ;;  %v1320_v48 = vld [vmem:[#allocation2 + $0x64] sm:$0xf]  ;;  %v1108_v52 = vor.u32 %v1322_v38, %v1105_v39 }
  0x31   : > { %v1239_v49 = vld [vmem:[#allocation2 + $0x180] sm:$0xf]  ;;  %v1357_v50 = vld [vmem:[#allocation2 + $0x184] sm:$0xf0]  ;;  %v1354_v51 = vld [vmem:[#allocation2 + $0x174] sm:$0xf]  ;;  %v1172_v53 = vor.u32 %v1338_v40, %v1169_v41  ;;  %v1176_v60 = vor.u32 %v1341_v45, %v1175_v44 }
  0x32   : > { %776 = vmatpush.bf16.msrb.mxu0 %v1072_v6  ;;  %789 = vmatpush.bf16.msrb.mxu1 %v1136_v7  ;;  %v1233_v54 = vld [vmem:[#allocation2 + $0x178] sm:$0xf0]  ;;  %v1370_v55 = vld [vmem:[#allocation2 + $0x1f4] sm:$0xf]  ;;  %v1097_v57 = vld [vmem:[#allocation2 + $0x68] sm:$0xf0]  ;;  %v1240_v61 = vor.u32 %v1357_v50, %v1239_v49 }
  0x33   : > { %v1297_v56 = vld [vmem:[#allocation2 + $0x1f8] sm:$0xf0]  ;;  %v1336_v58 = vld [vmem:[#allocation2 + $0xe4] sm:$0xf]  ;;  %v1161_v59 = vld [vmem:[#allocation2 + $0xe8] sm:$0xf0]  ;;  %v1236_v62 = vor.u32 %v1354_v51, %v1233_v54  ;;  %v1100_v0 = vor.u32 %v1320_v48, %v1097_v57 }
  0x34   : > { %802 = vmatpush.bf16.msrb.mxu2 %v1200_v14  ;;  %815 = vmatpush.bf16.msrb.mxu3 %v1264_v15  ;;  %v1300_v63 = vor.u32 %v1370_v55, %v1297_v56  ;;  %v1164_v1 = vor.u32 %v1336_v58, %v1161_v59  ;;  %v1318_v2 = vld [vmem:[#allocation2 + $0x54] sm:$0xf]  ;;  %v1089_v3 = vld [vmem:[#allocation2 + $0x58] sm:$0xf0]  ;;  %v1352_v8 = vld [vmem:[#allocation2 + $0x164] sm:$0xf] }
  0x35   : > { %v1334_v4 = vld [vmem:[#allocation2 + $0xd4] sm:$0xf]  ;;  %v1092_v5 = vor.u32 %v1318_v2, %v1089_v3  ;;  %v1153_v6 = vld [vmem:[#allocation2 + $0xd8] sm:$0xf0]  ;;  %v1225_v9 = vld [vmem:[#allocation2 + $0x168] sm:$0xf0] }
  0x36   : > { %777 = vmatpush.bf16.msrb.mxu0 %v1064_v18  ;;  %790 = vmatpush.bf16.msrb.mxu1 %v1128_v19  ;;  %v1156_v7 = vor.u32 %v1334_v4, %v1153_v6  ;;  %v1228_v10 = vor.u32 %v1352_v8, %v1225_v9  ;;  %v1368_v11 = vld [vmem:[#allocation2 + $0x1e4] sm:$0xf]  ;;  %v1289_v12 = vld [vmem:[#allocation2 + $0x1e8] sm:$0xf0]  ;;  %v1350_v20 = vld [vmem:[#allocation2 + $0x154] sm:$0xf] }
  0x37   : > { %v1292_v13 = vor.u32 %v1368_v11, %v1289_v12  ;;  %v1316_v14 = vld [vmem:[#allocation2 + $0x44] sm:$0xf]  ;;  %v1081_v15 = vld [vmem:[#allocation2 + $0x48] sm:$0xf0]  ;;  %v1217_v21 = vld [vmem:[#allocation2 + $0x158] sm:$0xf0] }
  0x38   : > { %803 = vmatpush.bf16.msrb.mxu2 %v1192_v26  ;;  %816 = vmatpush.bf16.msrb.mxu3 %v1256_v27  ;;  %v1332_v16 = vld [vmem:[#allocation2 + $0xc4] sm:$0xf]  ;;  %v1084_v17 = vor.u32 %v1316_v14, %v1081_v15  ;;  %v1145_v18 = vld [vmem:[#allocation2 + $0xc8] sm:$0xf0]  ;;  %v1366_v22 = vld [vmem:[#allocation2 + $0x1d4] sm:$0xf]  ;;  %v1220_v23 = vor.u32 %v1350_v20, %v1217_v21 }
  0x39   : > { %v1148_v19 = vor.u32 %v1332_v16, %v1145_v18  ;;  %v1281_v24 = vld [vmem:[#allocation2 + $0x1d8] sm:$0xf0]  ;;  %v1314_v26 = vld [vmem:[#allocation2 + $0x34] sm:$0xf]  ;;  %v1209_v33 = vld [vmem:[#allocation2 + $0x148] sm:$0xf0] }
  0x3a   : > { %778 = vmatpush.bf16.msrb.mxu0 %v1056_v31  ;;  %791 = vmatpush.bf16.msrb.mxu1 %v1120_v32  ;;  %v1284_v25 = vor.u32 %v1366_v22, %v1281_v24  ;;  %v1073_v27 = vld [vmem:[#allocation2 + $0x38] sm:$0xf0]  ;;  %v1330_v29 = vld [vmem:[#allocation2 + $0xb4] sm:$0xf]  ;;  %v1348_v32 = vld [vmem:[#allocation2 + $0x144] sm:$0xf] }
  0x3b   : > { %v1076_v28 = vor.u32 %v1314_v26, %v1073_v27  ;;  %v1137_v30 = vld [vmem:[#allocation2 + $0xb8] sm:$0xf0]  ;;  %v1364_v34 = vld [vmem:[#allocation2 + $0x1c4] sm:$0xf]  ;;  %v1212_v35 = vor.u32 %v1348_v32, %v1209_v33  ;;  %v1273_v36 = vld [vmem:[#allocation2 + $0x1c8] sm:$0xf0] }
  0x3c   : > { %804 = vmatpush.bf16.msrb.mxu2 %v1184_v42  ;;  %817 = vmatpush.bf16.msrb.mxu3 %v1248_v43  ;;  %v1140_v31 = vor.u32 %v1330_v29, %v1137_v30  ;;  %v1276_v37 = vor.u32 %v1364_v34, %v1273_v36  ;;  %v1312_v38 = vld [vmem:[#allocation2 + $0x24] sm:$0xf]  ;;  %v1065_v39 = vld [vmem:[#allocation2 + $0x28] sm:$0xf0]  ;;  %v1346_v44 = vld [vmem:[#allocation2 + $0x134] sm:$0xf] }
  0x3d   : > { %v1328_v40 = vld [vmem:[#allocation2 + $0xa4] sm:$0xf]  ;;  %v1068_v41 = vor.u32 %v1312_v38, %v1065_v39  ;;  %v1129_v42 = vld [vmem:[#allocation2 + $0xa8] sm:$0xf0]  ;;  %v1201_v45 = vld [vmem:[#allocation2 + $0x138] sm:$0xf0] }
  0x3e   : > { %779 = vmatpush.bf16.msrb.mxu0 %v1048_v46  ;;  %792 = vmatpush.bf16.msrb.mxu1 %v1112_v47  ;;  %v1132_v43 = vor.u32 %v1328_v40, %v1129_v42  ;;  %v1362_v46 = vld [vmem:[#allocation2 + $0x1b4] sm:$0xf]  ;;  %v1204_v47 = vor.u32 %v1346_v44, %v1201_v45  ;;  %v1265_v48 = vld [vmem:[#allocation2 + $0x1b8] sm:$0xf0]  ;;  %v1344_v55 = vld [vmem:[#allocation2 + $0x124] sm:$0xf] }
  0x3f   : > { %v1268_v49 = vor.u32 %v1362_v46, %v1265_v48  ;;  %v1310_v50 = vld [vmem:[#allocation2 + $0x14] sm:$0xf]  ;;  %v1057_v51 = vld [vmem:[#allocation2 + $0x18] sm:$0xf0]  ;;  %v1193_v56 = vld [vmem:[#allocation2 + $0x128] sm:$0xf0] }
  0x40   : > { %805 = vmatpush.bf16.msrb.mxu2 %v1176_v60  ;;  %818 = vmatpush.bf16.msrb.mxu3 %v1240_v61  ;;  %v1121_v54 = vld [vmem:[#allocation2 + $0x98] sm:$0xf0]  ;;  %v1196_v58 = vor.u32 %v1344_v55, %v1193_v56  ;;  %v1360_v59 = vld [vmem:[#allocation2 + $0x1a4] sm:$0xf]  ;;  %v1257_v60 = vld [vmem:[#allocation2 + $0x1a8] sm:$0xf0] }
  0x41   : > { %v1308_v61 = vld [vmem:[#allocation2 + $0x4] sm:$0xf]  ;;  %v1342_v4 = vld [vmem:[#allocation2 + $0x114] sm:$0xf]  ;;  %v1249_v8 = vld [vmem:[#allocation2 + $0x198] sm:$0xf0] }
  0x42   : > { %824 = vmatpush.bf16.msra.mxu0 %v1108_v52  ;;  %837 = vmatpush.bf16.msra.mxu1 %v1172_v53  ;;  %v1326_v52 = vld [vmem:[#allocation2 + $0x94] sm:$0xf]  ;;  %v1060_v53 = vor.u32 %v1310_v50, %v1057_v51  ;;  %v1177_v11 = vld [vmem:[#allocation2 + $0x108] sm:$0xf0]  ;;  %v1356_v12 = vld [vmem:[#allocation2 + $0x184] sm:$0xf] }
  0x43   : > { %v1124_v57 = vor.u32 %v1326_v52, %v1121_v54  ;;  %v1358_v6 = vld [vmem:[#allocation2 + $0x194] sm:$0xf]  ;;  %v1241_v14 = vld [vmem:[#allocation2 + $0x188] sm:$0xf0]  ;;  %v285_v16 = vld [vmem:[%s1722_s2] sm:$0xf] }
  0x44   : > { %850 = vmatpush.bf16.msra.mxu2 %v1236_v62  ;;  %863 = vmatpush.bf16.msra.mxu3 %v1300_v63  ;;  %v1260_v62 = vor.u32 %v1360_v59, %v1257_v60  ;;  %v1049_v63 = vld [vmem:[#allocation2 + $0x8] sm:$0xf0]  ;;  %v1252_v9 = vor.u32 %v1358_v6, %v1249_v8  ;;  %v1244_v15 = vor.u32 %v1356_v12, %v1241_v14  ;;  %v288_v18 = vperm.slane %v285_v16, 1  ;;  %s268_s14 = scalar_lea.vmem [#allocation5], %s1039_s13  ;;  %s1372_s15 = sshll.u32 %s1553_s21, 4 }
  0x45   : > { %v1052_v2 = vor.u32 %v1308_v61, %v1049_v63  ;;  %v290_v26 = vperm.slane %v285_v16, 3  ;;  %s930_s24 = scalar_lea.hbm %s1725_s5, %s1372_s15  ;;  %s932_s25 = sshll.u32 %s268_s14, 4  ;;  %s933_s25 = int_to_ptr.vmem [resolvable:$true] %s932_s25 }
  0x46   : > { %825 = vmatpush.bf16.msra.mxu0 %v1100_v0  ;;  %838 = vmatpush.bf16.msra.mxu1 %v1164_v1  ;;  %v1324_v0 = vld [vmem:[#allocation2 + $0x84] sm:$0xf]  ;;  %v1113_v1 = vld [vmem:[#allocation2 + $0x88] sm:$0xf0]  ;;  %s934_s27 = sshll.u32 %s930_s24, 4  ;;  %s917_s21 = scalar_lea.sflag [#allocation4], %s266_s12  ;;  %s935_s27 = int_to_ptr.hbm [resolvable:$true] %s934_s27 }
  0x47   : > { %v1116_v3 = vor.u32 %v1324_v0, %v1113_v1  ;;  %s1493_s29 = sshra.s32 %s935_s27, 4  ;;  %s1499_s10 = scalar_lea.hbm %s1725_s5, 32  ;;  %s1494_s29 = int_to_ptr.hbm [resolvable:$true] %s1493_s29 }
  0x48   : > { %851 = vmatpush.bf16.msra.mxu2 %v1228_v10  ;;  %864 = vmatpush.bf16.msra.mxu3 %v1292_v13  ;;  %v1340_v10 = vld [vmem:[#allocation2 + $0x104] sm:$0xf]  ;;  %s1495_s7 = scalar_lea.hbm %s1494_s29, 16  ;;  %p1500_p5 = scmp.lt.s32.totalorder %s1494_s29, %s1725_s5 }
  0x49   : > { %v1180_v13 = vor.u32 %v1340_v10, %v1177_v11  ;;  %p1496_p1 = scmp.ne.s32.totalorder %s1494_s29, %s1495_s7  ;;  %p1501_p6 = scmp.lt.s32.totalorder %s1499_s10, %s1495_s7 }
  0x4a   : > { %826 = vmatpush.bf16.msra.mxu0 %v1092_v5  ;;  %839 = vmatpush.bf16.msra.mxu1 %v1156_v7  ;;  %v1185_v5 = vld [vmem:[#allocation2 + $0x118] sm:$0xf0] }
  0x4b   : > { %v1188_v7 = vor.u32 %v1342_v4, %v1185_v5  ;;  %p1497_p2 = pnand %p1496_p1, %p1636_p4  ;;  %p1502_p7 = por %p1501_p6, %p1500_p5 }
  0x4c   : > { %852 = vmatpush.bf16.msra.mxu2 %v1220_v23  ;;  %865 = vmatpush.bf16.msra.mxu3 %v1284_v25  ;;  %v289_v25 = vperm.slane %v285_v16, 2 }
  0x4d   : > { %p1498_p3 = pneg %p1497_p2 }
  0x4e   : > { %827 = vmatpush.bf16.msra.mxu0 %v1084_v17  ;;  %840 = vmatpush.bf16.msra.mxu1 %v1148_v19  ;;  %v287_v17 = vperm.slane %v285_v16, 0 }
  0x4f   : > { %p1503_p9 = pnand %p1502_p7, %p1498_p3 }
  0x50   : > { %853 = vmatpush.bf16.msra.mxu2 %v1212_v35  ;;  %866 = vmatpush.bf16.msra.mxu3 %v1276_v37 }
  0x52   : > { %828 = vmatpush.bf16.msra.mxu0 %v1076_v28  ;;  %841 = vmatpush.bf16.msra.mxu1 %v1140_v31 }
  0x54   : > { %854 = vmatpush.bf16.msra.mxu2 %v1204_v47  ;;  %867 = vmatpush.bf16.msra.mxu3 %v1268_v49 }
  0x56   : > { %829 = vmatpush.bf16.msra.mxu0 %v1068_v41  ;;  %842 = vmatpush.bf16.msra.mxu1 %v1132_v43  ;;  %v446_v41 = vld [vmem:[%s1724_s4] sm:$0x3] }
  0x57   : > { %v448_v44 = vperm.slane %v446_v41, 0  ;;  %v449_v56 = vperm.slane %v446_v41, 1 }
  0x58   : > { %855 = vmatpush.bf16.msra.mxu2 %v1196_v58  ;;  %868 = vmatpush.bf16.msra.mxu3 %v1260_v62 }
  0x5a   : > { %830 = vmatpush.bf16.msra.mxu0 %v1060_v53  ;;  %843 = vmatpush.bf16.msra.mxu1 %v1124_v57 }
  0x5c   : > { %856 = vmatpush.bf16.msra.mxu2 %v1188_v7  ;;  %869 = vmatpush.bf16.msra.mxu3 %v1252_v9 }
  0x5e   : > { %831 = vmatpush.bf16.msra.mxu0 %v1052_v2  ;;  %844 = vmatpush.bf16.msra.mxu1 %v1116_v3 }
  0x60   : > { %857 = vmatpush.bf16.msra.mxu2 %v1180_v13  ;;  %870 = vmatpush.bf16.msra.mxu3 %v1244_v15 }
  0x9e   : > { %v331_v19 = vpop.f32.mrf.mxu0  ;;  %v344_v20 = vpop.f32.mrf.mxu1 }
  0x9f   : > { %v332_v21 = vadd.f32 %v331_v19, %v287_v17  ;;  %v345_v22 = vadd.f32 %v344_v20, %v288_v18 }
  0xa1   : > { %v374_v23 = vmax.f32 %v332_v21, 0.0  ;;  %v375_v24 = vmax.f32 %v345_v22, 0.0 }
  0xa3   : > { %v378_v27 = vpack.c.bf16 %v374_v23, %v374_v23  ;;  %v379_v28 = vpack.c.bf16 %v375_v24, %v375_v24 }
  0xa5   : > { %780 = vmatmul.bf16.vlgmr.msrb.gmra.mxu0 %v378_v27  ;;  %793 = vmatmul.bf16.vlgmr.msrb.gmra.mxu1 %v379_v28 }
  0xa6   : > { %v357_v29 = vpop.f32.mrf.mxu2  ;;  %v370_v30 = vpop.f32.mrf.mxu3 }
  0xa7   : > { %v358_v31 = vadd.f32 %v357_v29, %v289_v25  ;;  %v371_v32 = vadd.f32 %v370_v30, %v290_v26  ;;  %v333_v33 = vpop.f32.mrf.mxu0  ;;  %v346_v34 = vpop.f32.mrf.mxu1 }
  0xa9   : > { %v376_v35 = vmax.f32 %v358_v31, 0.0  ;;  %v377_v36 = vmax.f32 %v371_v32, 0.0 }
  0xab   : > { %v380_v37 = vpack.c.bf16 %v376_v35, %v376_v35  ;;  %v381_v38 = vpack.c.bf16 %v377_v36, %v377_v36 }
  0xad   : > { %806 = vmatmul.bf16.vlgmr.msrb.gmra.mxu2 %v380_v37  ;;  %819 = vmatmul.bf16.vlgmr.msrb.gmra.mxu3 %v381_v38 }
  0xae   : > { %v359_v39 = vpop.f32.mrf.mxu2  ;;  %v372_v40 = vpop.f32.mrf.mxu3 }
  0xb5   : > { %832 = vmatmul.bf16.vlgmr.msra.gmra.mxu0 %v378_v27  ;;  %845 = vmatmul.bf16.vlgmr.msra.gmra.mxu1 %v379_v28 }
  0xbd   : > { %858 = vmatmul.bf16.vlgmr.msra.gmra.mxu2 %v380_v37  ;;  %871 = vmatmul.bf16.vlgmr.msra.gmra.mxu3 %v381_v38 }
 0x122   : > { %v781_v42 = vpop.f32.mrf.mxu0  ;;  %v794_v43 = vpop.f32.mrf.mxu1 }
 0x123   : > { %v782_v45 = vadd.f32 %v781_v42, %v448_v44 }
 0x125   : > { %v795_v48 = vadd.f32 %v794_v43, %v782_v45 }
 0x12a   : > { %v783_v46 = vpop.f32.mrf.mxu0  ;;  %v796_v47 = vpop.f32.mrf.mxu1 }
 0x130   : > { %v807_v49 = vpop.f32.mrf.mxu2  ;;  %v820_v50 = vpop.f32.mrf.mxu3 }
 0x131   : > { %v808_v51 = vadd.f32 %v807_v49, %v795_v48 }
 0x132   : > { %v833_v53 = vpop.f32.mrf.mxu0  ;;  %v846_v54 = vpop.f32.mrf.mxu1 }
 0x133   : > { %v821_v52 = vadd.f32 %v820_v50, %v808_v51  ;;  %v834_v59 = vadd.f32 %v833_v53, %v449_v56 }
 0x135   : > { %v1301_v55 = vmul.f32 -1.442695, %v821_v52  ;;  %v847_v0 = vadd.f32 %v846_v54, %v834_v59 }
 0x137   : > { %1441 = vpow2.f32 %v1301_v55 }
 0x138   : > { %v809_v57 = vpop.f32.mrf.mxu2  ;;  %v822_v58 = vpop.f32.mrf.mxu3 }
 0x13a   : > { %v835_v60 = vpop.f32.mrf.mxu0  ;;  %v848_v61 = vpop.f32.mrf.mxu1 }
 0x13d   : > { %v1442_v62 = vpop.eup %1441 }
 0x13e   : > { %v882_v63 = vadd.f32 1.0, %v1442_v62 }
 0x140   : > { %1443 = vrcp.f32 %v882_v63  ;;  %v859_v1 = vpop.f32.mrf.mxu2  ;;  %v872_v2 = vpop.f32.mrf.mxu3  ;;  %v895_v11 = vand.u32 2147483648, %v882_v63  ;;  %v893_v13 = vand.u32 2147483647, %v882_v63  ;;  %vm889_vm3 = vweird.f32 %v882_v63 }
 0x141   : > { %v860_v3 = vadd.f32 %v859_v1, %v847_v0 }
 0x142   : > { %v896_v17 = vor.u32 1.1754944e-38, %v895_v11  ;;  %vm894_vm5 = vcmp.eq.f32.partialorder %v893_v13, 8.507059e+37 }
 0x143   : > { %v873_v4 = vadd.f32 %v872_v2, %v860_v3 }
 0x145   : > { %v1302_v5 = vmul.f32 -1.442695, %v873_v4 }
 0x146   : > { %v1444_v6 = vpop.eup %1443 }
 0x147   : > { %v885_v7 = vmul.f32 %v1444_v6, %v882_v63  ;;  %1445 = vpow2.f32 %v1302_v5  ;;  %vm890_vm2 = vweird.f32 %v1444_v6 }
 0x148   : > { %v861_v8 = vpop.f32.mrf.mxu2  ;;  %v874_v9 = vpop.f32.mrf.mxu3  ;;  %vm891_vm4 = vmor %vm889_vm3, %vm890_vm2 }
 0x149   : > { %v886_v10 = vsub.f32 1.0, %v885_v7 }
 0x14b   : > { %v887_v12 = vmul.f32 %v1444_v6, %v886_v10 }
 0x14d   : > { %v1446_v14 = vpop.eup %1445  ;;  %v888_v15 = vadd.f32 %v1444_v6, %v887_v12 }
 0x14e   : > { %v883_v16 = vadd.f32 1.0, %v1446_v14 }
 0x14f   : > { %v892_v18 = vsel %vm891_vm4, %v1444_v6, %v888_v15 }
 0x150   : > { %1447 = vrcp.f32 %v883_v16  ;;  %v897_v19 = vsel %vm894_vm5, %v896_v17, %v892_v18  ;;  %v910_v23 = vand.u32 2147483648, %v883_v16  ;;  %v908_v25 = vand.u32 2147483647, %v883_v16 }
 0x151   : > { %914 = vst [vmem:[%s268_s14] sm:$0xff] %v897_v19  ;;  %vm904_vm7 = vweird.f32 %v883_v16 }
 0x152   : > { %v911_v27 = vor.u32 1.1754944e-38, %v910_v23  ;;  %vm909_vm9 = vcmp.eq.f32.partialorder %v908_v25, 8.507059e+37 }
 0x156   : > { %v1448_v20 = vpop.eup %1447 }
 0x157   : > { %v900_v21 = vmul.f32 %v1448_v20, %v883_v16  ;;  %vm905_vm6 = vweird.f32 %v1448_v20 }
 0x158   : > { %vm906_vm8 = vmor %vm904_vm7, %vm905_vm6 }
 0x159   : > { %v901_v22 = vsub.f32 1.0, %v900_v21 }
 0x15b   : > { %v902_v24 = vmul.f32 %v1448_v20, %v901_v22 }
 0x15d   : > { %v903_v26 = vadd.f32 %v1448_v20, %v902_v24 }
 0x15f   : > { %v907_v28 = vsel %vm906_vm8, %v1448_v20, %v903_v26 }
 0x160   : > { %v912_v29 = vsel %vm909_vm9, %v911_v27, %v907_v28 }
 0x161   : > { %915 = vst [vmem:[%s268_s14 + $0x8] sm:$0xff] %v912_v29 }
 0x162   : > { %1506 = shalt.err (!%p1503_p9)
}
 0x163   : > { %1377 = dma.vmem_to_hbm [thread:$0]  (%p1636_p4), %s933_s25, 256, %s935_s27, %s917_s21  }
 0x164 PF: > { %p1389_p10 = scmp.ge.s32.totalorder %s1561_s23, 2  ;;  %s946_s12 = sand.u32 1, %s1541_s18  }
 0x165   : > { %s947_s14 = scalar_lea.sflag [#allocation4], %s946_s12 }
 0x166   : > { %p1384_p11 = pnand %p1389_p10, %p1643_p8 }
 0x168   : > { %p1385_p12 = pneg %p1384_p11 }
 0x16a   : > { %1536 = dma.done.wait (%p1385_p12), %s947_s14, 256  }
 0x16b   : > { %1538 = vsyncadd (%p1385_p12), %s947_s14, 4294967040  ;;  %s19_s23 = sadd.s32 1, %s1561_s23   ;;  %s1728_s18 = smov %s1545_s19 }
 0x16c   : > { %p16_p13 = scmp.ge.s32.totalorder %s19_s23, 4   ;;  %s1729_s19 = smov %s1549_s20 }
 0x16d   : > { %s1730_s20 = smov %s1649_s6  ;;  %s1731_s21 = smov %s1557_s22 }
 0x16e   : > { %s1732_s22 = smov %s1734_s26  ;;  %18 = sbr.rel (!%p16_p13) target bundleno = 5 (0x5), region = 84 }
 0x173   :  { %953 = vsyncpa [#allocation3], 1 }
 0x174   :  { %955 = vsyncpa [#allocation3 + $0x1], 1 }
 0x175   :  { %956 = vsyncpa [#allocation4], 1 }
 0x176   :  { %958 = vsyncpa [#allocation4 + $0x1], 1 }

</bundles_post_ra>
